<compile_context>
chip_gen: v6e
topology: v6e:2x2x1
jax: 0.10.0
libtpu: 0.0.40
codegen_flags: <defaults>
</compile_context>

<pallas_src>
import jax
import jax.numpy as jnp
from jax.experimental import pallas as pl
from jax.experimental.pallas import tpu as pltpu


def _copy_kernel(x_ref, o_ref):
    # Pure pass-through: copy the current VMEM tile to the output tile.
    o_ref[...] = x_ref[...]


def none_layer(x: jax.Array) -> jax.Array:
    """NoneLayer.forward(x) == x.  Identity needs zero HBM traffic."""
    return x


def _pick_lane_dense_2d(total: int) -> tuple[int, int]:
    # Prefer a lane width in [512, 2048] that divides the element count so the
    # output is lane-dense (multiple of 128 -> unmasked vst, full DMA bursts).
    for lane in (512, 1024, 2048, 256, 128):
        if total % lane == 0:
            return total // lane, lane
    # Fallback: single full-array row (block == full array dims is always legal).
    return 1, total


def _pick_tile_rows(m: int, lane: int, itemsize: int,
                    target_bytes: int = 2 * 1024 * 1024) -> int:
    # Largest multiple of 8 that divides m with block bytes <= ~2 MiB so the
    # copy pipelines and stays far below v5e/v7x scoped-VMEM limits even when
    # double-buffered (in + out, 2 buffers each -> ~8 MiB peak).
    max_rows = max(8, target_bytes // max(1, lane * itemsize))
    best = 0
    t = 8
    limit = min(m, max_rows)
    while t <= limit:
        if m % t == 0:
            best = t
        t += 8
    return best if best > 0 else m  # m itself == full dim -> always legal


def none_layer_copy(x: jax.Array) -> jax.Array:
    """Materialized identity copy as a tiled, lane-dense Pallas kernel.

    Only needed when a fresh output buffer is explicitly required; otherwise
    use `none_layer` (returns x directly).
    """
    orig_shape = x.shape
    total = x.size
    if total == 0:
        return x

    m, lane = _pick_lane_dense_2d(total)
    x2 = x.reshape(m, lane)
    tile_m = _pick_tile_rows(m, lane, x2.dtype.itemsize)
    grid_m = m // tile_m

    out = pl.pallas_call(
        _copy_kernel,
        out_shape=jax.ShapeDtypeStruct((m, lane), x2.dtype),
        grid=(grid_m,),
        in_specs=[pl.BlockSpec((tile_m, lane), lambda i: (i, 0))],
        out_specs=pl.BlockSpec((tile_m, lane), lambda i: (i, 0)),
        # Alias input -> output so XLA can reuse the HBM buffer (and elide the
        # copy entirely when the caller donates x at a jit boundary).
        input_output_aliases={0: 0},
        compiler_params=pltpu.CompilerParams(
            # Row-tile axis is embarrassingly parallel: shards the copy across
            # both TensorCores on v7x; harmless no-op on v5e/v6e.
            dimension_semantics=("parallel",),
            vmem_limit_bytes=32 * 1024 * 1024,
        ),
    )(x2)

    return out.reshape(orig_shape)


if __name__ == "__main__":
    key = jax.random.PRNGKey(0)
    # NCHW input, consistent with what a VGG/PSP backbone layer would see.
    x = jax.random.normal(key, (2, 4, 16, 16), dtype=jnp.float32)

    # Preferred path: identity is free (no kernel, no HBM traffic).
    y_fast = none_layer(x)
    assert y_fast is x

    # Kernel path: materialized copy through the tiled Pallas kernel.
    y = none_layer_copy(x)
    jax.block_until_ready(y)

    assert y.shape == x.shape and y.dtype == x.dtype
    assert bool(jnp.all(y == x))
    print("KERNEL_OK")
</pallas_src>

<mosaic_0001>
module attributes {stable_mosaic.version = 11 : i64} {
  func.func @_copy_kernel(%arg0: i32, %arg1: memref<4x512xf32, #tpu.memory_space<vmem>>, %arg2: memref<4x512xf32, #tpu.memory_space<vmem>>) attributes {dimension_semantics = [#tpu.dimension_semantics<parallel>], iteration_bounds = array<i64: 1>, scalar_prefetch = 0 : i64, scratch_operands = 0 : i64, tpu.core_type = #tpu.core_type<tc>, window_params = [{transform_indices = @transform_0, window_bounds = array<i64: 4, 512>}, {transform_indices = @transform_1, window_bounds = array<i64: 4, 512>}]} {
    %c0 = arith.constant 0 : index
    %c0_0 = arith.constant 0 : index
    %0 = vector.load %arg1[%c0, %c0_0] : memref<4x512xf32, #tpu.memory_space<vmem>>, vector<4x512xf32>
    %c0_1 = arith.constant 0 : index
    %c0_2 = arith.constant 0 : index
    %1 = vector.load %arg2[%c0_1, %c0_2] : memref<4x512xf32, #tpu.memory_space<vmem>>, vector<4x512xf32>
    tpu.vector_store %arg2[%c0_1, %c0_2], %0 {strides = array<i32>} : memref<4x512xf32, #tpu.memory_space<vmem>>, vector<4x512xf32>,
    return
  }
  func.func @transform_0(%arg0: i32) -> (i32, i32) {
    %c0_i32 = arith.constant 0 : i32
    %c0_i32_0 = arith.constant 0 : i32
    return %arg0, %c0_i32 : i32, i32
  }
  func.func @transform_1(%arg0: i32) -> (i32, i32) {
    %c0_i32 = arith.constant 0 : i32
    %c0_i32_0 = arith.constant 0 : i32
    return %arg0, %c0_i32 : i32, i32
  }
}

</mosaic_0001>

<bundles_post_ra>
// kernel: tpu_custom_call.1
= control target key start
LH: loop header
LB: loop body
LE: loop exit
PB: predicated region body
PF: predicated region fallthrough
CT: control target
= control target key end

     0   :  { %6 = vsyncpa [#allocation3], 0  ;;  %s104_s0 = inlined_call_operand.hbm [shape: f32[4,512], index: 0, kind: input, shape index: {}, may-alias: {0,1}]   ;;  %s105_s1 = inlined_call_operand.hbm [shape: f32[4,512], index: 1, kind: output, shape index: {}, may-alias: {0,1}]  }
   0x1   :  { %7 = vsyncpa [#allocation4], 0  ;;  %s86_s6 = smov [#allocation2]  }
   0x2   :  { %s14_s7 = sshll.u32 %s86_s6, 4  ;;  %s15_s7 = int_to_ptr.vmem [resolvable:$true] %s14_s7 }
   0x3   :  { %s50_s8 = scalar_lea.vmem %s15_s7, 256  ;;  %p55_p1 = scmp.lt.s32.totalorder %s15_s7, %s15_s7 }
   0x4   :  { %p51_p0 = scmp.ne.s32.totalorder %s15_s7, %s50_s8  ;;  %p56_p2 = scmp.lt.s32.totalorder %s50_s8, %s50_s8 }
   0x6   :  { %p57_p3 = por %p56_p2, %p55_p1 }
   0x8   :  { %p58_p4 = pnand %p57_p3, %p51_p0 }
   0xa   :  { %61 = shalt.err (!%p58_p4)
}
   0xb   :  { %17 = dma.hbm_to_vmem [thread:$0]  %s104_s0, 256, %s15_s7, [#allocation3]  }
   0xc   :  { %82 = dma.done.wait [#allocation3], 256  }
   0xd   :  { %83 = vsyncadd [#allocation3], 4294967040  ;;  %s87_s11 = smov [#allocation5]   ;;  %v21_v0 = vld [vmem:[#allocation2] sm:$0xff]  ;;  %v22_v1 = vld [vmem:[#allocation2 + $0x8] sm:$0xff] }
   0xe   :  { %s31_s12 = sshll.u32 %s87_s11, 4  ;;  %23 = vst [vmem:[#allocation5] sm:$0xff] %v21_v0  ;;  %24 = vst [vmem:[#allocation5 + $0x8] sm:$0xff] %v22_v1  ;;  %s32_s12 = int_to_ptr.vmem [resolvable:$true] %s31_s12 }
   0xf   :  { %s62_s13 = scalar_lea.vmem %s32_s12, 256  ;;  %p67_p6 = scmp.lt.s32.totalorder %s32_s12, %s32_s12 }
  0x10   :  { %p63_p5 = scmp.ne.s32.totalorder %s32_s12, %s62_s13  ;;  %p68_p7 = scmp.lt.s32.totalorder %s62_s13, %s62_s13 }
  0x12   :  { %p69_p8 = por %p68_p7, %p67_p6 }
  0x14   :  { %p70_p9 = pnand %p69_p8, %p63_p5 }
  0x16   :  { %73 = shalt.err (!%p70_p9)
}
  0x17   :  { %34 = dma.vmem_to_hbm [thread:$0]  %s32_s12, 256, %s105_s1, [#allocation4]  }
  0x18   :  { %84 = dma.done.wait [#allocation4], 256  }
  0x19   :  { %85 = vsyncadd [#allocation4], 4294967040 }
  0x1a   :  { %38 = vsyncpa [#allocation3], 1 }
  0x1b   :  { %39 = vsyncpa [#allocation4], 1 }

</bundles_post_ra>
